<compile_context>
chip_gen: v7x
topology: tpu7x:2x2x1
jax: 0.10.0
libtpu: 0.0.40
codegen_flags: <defaults>
</compile_context>

<pallas_src>
import jax
import jax.numpy as jnp
from jax.experimental import pallas as pl
from jax.experimental.pallas import tpu as pltpu


def _round_up(x, m):
    return ((x + m - 1) // m) * m


def _pick_tile_blocks(nblocks, cap, max_waste_frac=0.07):
    """Pick a tile size (in 128-blocks) <= cap that pads `nblocks` by at most
    ~max_waste_frac extra blocks.  Prefers the largest admissible tile."""
    cap = max(1, min(cap, nblocks))
    allowed_waste = max(0, int(nblocks * max_waste_frac))
    for c in range(cap, 0, -1):
        if (-nblocks) % c <= allowed_waste:
            return c
    return 1


# ----------------------------- Pallas kernel -------------------------------
def _conv_matmul_kernel(p_ref, w_ref, b_ref, o_ref, acc_ref):
    # p_ref:   (tm, tk)  im2col'd input window tile (compute dtype, e.g. bf16)
    # w_ref:   (tk, tn)  reshaped conv-weight tile  (compute dtype)
    # b_ref:   (1,  tn)  bias tile (f32)
    # o_ref:   (tm, tn)  output tile
    # acc_ref: (tm, tn)  f32 accumulator, resident across the K grid axis
    k = pl.program_id(2)

    @pl.when(k == 0)
    def _():
        acc_ref[...] = jnp.zeros_like(acc_ref)

    acc_ref[...] += jnp.dot(p_ref[...], w_ref[...],
                            preferred_element_type=jnp.float32)

    @pl.when(k == pl.num_programs(2) - 1)
    def _():
        # Bias is added exactly once, in f32, in the finalize branch.
        o_ref[...] = (acc_ref[...] + b_ref[...]).astype(o_ref.dtype)


def _conv_matmul(patches, w2d, bias2d, out_dtype, tm, tk, tn):
    """Tiled, pipelined (M_pad, K_pad) @ (K_pad, Cout_pad) + bias on the MXU."""
    M_pad, K_pad = patches.shape
    Cout_pad = w2d.shape[1]
    grid = (M_pad // tm, Cout_pad // tn, K_pad // tk)   # K (reduction) last

    in_item = jnp.dtype(patches.dtype).itemsize
    out_item = jnp.dtype(out_dtype).itemsize
    cost = pl.CostEstimate(
        flops=2 * M_pad * K_pad * Cout_pad,
        transcendentals=0,
        bytes_accessed=(
            in_item * (M_pad * K_pad * (Cout_pad // tn)     # patches re-streams
                       + K_pad * Cout_pad * (M_pad // tm))  # weight re-streams
            + out_item * M_pad * Cout_pad
            + 4 * Cout_pad),
    )

    return pl.pallas_call(
        _conv_matmul_kernel,
        out_shape=jax.ShapeDtypeStruct((M_pad, Cout_pad), out_dtype),
        grid_spec=pltpu.PrefetchScalarGridSpec(
            num_scalar_prefetch=0,
            grid=grid,
            in_specs=[
                pl.BlockSpec((tm, tk), lambda i, j, k: (i, k)),   # patches
                pl.BlockSpec((tk, tn), lambda i, j, k: (k, j)),   # weights
                pl.BlockSpec((1, tn), lambda i, j, k: (0, j)),    # bias
            ],
            out_specs=pl.BlockSpec((tm, tn), lambda i, j, k: (i, j)),
            scratch_shapes=[pltpu.VMEM((tm, tn), jnp.float32)],
        ),
        compiler_params=pltpu.CompilerParams(
            dimension_semantics=("parallel", "parallel", "arbitrary"),
            # Worst-case tiles here need < ~30 MiB including double buffers;
            # 48 MiB is safely below physical VMEM on v7x (64 MiB/TC) and
            # v5e/v6e (128 MiB).
            vmem_limit_bytes=48 * 1024 * 1024,
        ),
        cost_estimate=cost,
    )(patches, w2d, bias2d)


# ----------------------------- wrapper (glue) -------------------------------
def downsample(x_nchw, weight, bias, padding=1, compute_dtype=jnp.bfloat16):
    """Conv2d(in_ch, out_ch, kernel_size=3, stride=2, padding=padding).

    x_nchw: (N, Cin, H, W)
    weight: (Cout, Cin, 3, 3)  (PyTorch OIHW layout)
    bias:   (Cout,)
    compute_dtype: matmul operand dtype.  Defaults to bf16 (MXU-native on
        v6e/v7x, halves HBM traffic of the im2col patches); accumulation is
        always f32.  Pass jnp.float32 for closer parity with PyTorch f32 conv.
    returns (N, Cout, OH, OW) in x_nchw.dtype.
    """
    N, Cin, H, W = x_nchw.shape
    Cout = weight.shape[0]
    KH = KW = 3
    stride = 2
    OH = (H + 2 * padding - KH) // stride + 1
    OW = (W + 2 * padding - KW) // stride + 1

    out_dtype = x_nchw.dtype
    compute_dtype = compute_dtype or out_dtype

    # NCHW -> NHWC, cast to compute dtype BEFORE im2col so the 2.25x-inflated
    # patches tensor is materialized (and later re-read) at half the bytes,
    # then zero-pad spatially (glue).
    x = jnp.transpose(x_nchw, (0, 2, 3, 1)).astype(compute_dtype)
    x = jnp.pad(x, ((0, 0), (padding, padding), (padding, padding), (0, 0)))

    # im2col: gather the 9 strided taps.  Flattened K order is (kh, kw, cin),
    # matching the weight reshape below.
    # TODO(synk): fold this gather into the kernel (manual DMA of strided input
    # row slabs + 9 accumulated per-tap dots) to avoid materializing the ~2.25x
    # patches tensor in HBM; kept in XLA here for robustness.
    taps = []
    for kh in range(KH):
        for kw in range(KW):
            taps.append(x[:, kh:kh + stride * OH:stride,
                          kw:kw + stride * OW:stride, :])       # (N, OH, OW, Cin)
    patches = jnp.stack(taps, axis=3)                            # (N, OH, OW, 9, Cin)
    patches = patches.reshape(N * OH * OW, KH * KW * Cin)        # (M, K)

    # (Cout, Cin, KH, KW) -> (KH, KW, Cin, Cout) -> (K, Cout)
    w2d = jnp.transpose(weight, (2, 3, 1, 0)).reshape(KH * KW * Cin, Cout)
    w2d = w2d.astype(compute_dtype)
    b2d = bias.reshape(1, Cout).astype(jnp.float32)

    M, K = patches.shape

    # ---- tile sizes (multiples of 128 that DIVIDE the 128-padded extents) ----
    m_blocks = _round_up(M, 128) // 128
    k_blocks = _round_up(K, 128) // 128
    n_blocks = _round_up(Cout, 128) // 128

    # tn: cover the full (128-padded) Cout in one tile whenever it fits (<=1024)
    # so the big `patches` operand is streamed from HBM only once.
    tn_b = _pick_tile_blocks(n_blocks, cap=8)
    # tk: as deep as possible (fewer K steps / accumulator RMWs) with <=~7%
    # zero-pad waste on K.
    tk_b = _pick_tile_blocks(k_blocks, cap=8)
    # tm: big tiles amortize pipeline overhead and weight re-reads; M-padding
    # waste is bounded by (tm-1) rows, negligible at real Downsample sizes.
    tm_b = min(m_blocks, 8)

    # VMEM budget guard (double-buffered inputs/outputs + f32 accumulator);
    # conservative for v7x's 64 MiB per-core VMEM.
    in_item = jnp.dtype(compute_dtype).itemsize
    out_item = jnp.dtype(out_dtype).itemsize

    def _vmem_bytes(tmb, tkb, tnb):
        tm_, tk_, tn_ = 128 * tmb, 128 * tkb, 128 * tnb
        return (2 * tm_ * tk_ * in_item + 2 * tk_ * tn_ * in_item
                + 2 * tm_ * tn_ * out_item + tm_ * tn_ * 4 + 2 * tn_ * 4)

    budget = 40 * 1024 * 1024
    while _vmem_bytes(tm_b, tk_b, tn_b) > budget and tk_b > 1:
        tk_b = _pick_tile_blocks(k_blocks, cap=tk_b - 1)
    while _vmem_bytes(tm_b, tk_b, tn_b) > budget and tm_b > 1:
        tm_b -= 1

    tm, tk, tn = 128 * tm_b, 128 * tk_b, 128 * tn_b

    M_pad = _round_up(M, tm)
    K_pad = _round_up(_round_up(K, 128), tk)
    Cout_pad = _round_up(_round_up(Cout, 128), tn)

    patches = jnp.pad(patches, ((0, M_pad - M), (0, K_pad - K)))
    w2d = jnp.pad(w2d, ((0, K_pad - K), (0, Cout_pad - Cout)))
    b2d = jnp.pad(b2d, ((0, 0), (0, Cout_pad - Cout)))

    out = _conv_matmul(patches, w2d, b2d, out_dtype, tm, tk, tn)  # (M_pad, Cout_pad)

    out = out[:M, :Cout].reshape(N, OH, OW, Cout)
    return jnp.transpose(out, (0, 3, 1, 2))                      # NCHW (PyTorch API)


# --------------------------- reference (for check) --------------------------
def _reference(x_nchw, weight, bias, padding=1):
    return jax.lax.conv_general_dilated(
        x_nchw, weight, window_strides=(2, 2),
        padding=[(padding, padding), (padding, padding)],
        dimension_numbers=("NCHW", "OIHW", "NCHW"),
        preferred_element_type=jnp.float32,
    ) + bias.reshape(1, -1, 1, 1)


if __name__ == "__main__":
    key = jax.random.PRNGKey(0)
    k_x, k_w, k_b = jax.random.split(key, 3)

    N, Cin, H, W = 2, 4, 16, 16
    Cout = 4

    x = jax.random.normal(k_x, (N, Cin, H, W), dtype=jnp.float32)
    # Deterministic synthetic parameters (PyTorch-like uniform fan-in init).
    fan_in = Cin * 3 * 3
    bound = 1.0 / (fan_in ** 0.5)
    weight = jax.random.uniform(k_w, (Cout, Cin, 3, 3), jnp.float32, -bound, bound)
    bias = jax.random.uniform(k_b, (Cout,), jnp.float32, -bound, bound)

    y_ref = jax.block_until_ready(_reference(x, weight, bias, padding=1))

    # Default (bf16 operands, f32 accumulation) — bf16-level tolerance.
    y = jax.block_until_ready(downsample(x, weight, bias, padding=1))
    assert y.shape == (N, Cout, 8, 8), y.shape
    assert jnp.allclose(y, y_ref, atol=3e-2, rtol=3e-2), \
        float(jnp.max(jnp.abs(y - y_ref)))

    # Explicit f32 compute path — tight tolerance.
    y32 = jax.block_until_ready(
        downsample(x, weight, bias, padding=1, compute_dtype=jnp.float32))
    assert jnp.allclose(y32, y_ref, atol=1e-4, rtol=1e-4), \
        float(jnp.max(jnp.abs(y32 - y_ref)))

    print("KERNEL_OK")
</pallas_src>

<mosaic_0001>
module attributes {stable_mosaic.version = 11 : i64} {
  func.func @_conv_matmul_kernel(%arg0: i32, %arg1: i32, %arg2: i32, %arg3: memref<128x128xbf16, #tpu.memory_space<vmem>>, %arg4: memref<128x128xbf16, #tpu.memory_space<vmem>>, %arg5: memref<1x128xf32, #tpu.memory_space<vmem>>, %arg6: memref<128x128xf32, #tpu.memory_space<vmem>>, %arg7: memref<128x128xf32, #tpu.memory_space<vmem>>) attributes {dimension_semantics = [#tpu.dimension_semantics<parallel>, #tpu.dimension_semantics<parallel>, #tpu.dimension_semantics<arbitrary>], iteration_bounds = array<i64: 1, 1, 1>, scalar_prefetch = 0 : i64, scratch_operands = 1 : i64, tpu.core_type = #tpu.core_type<tc>, window_params = [{transform_indices = @transform_0, window_bounds = array<i64: 128, 128>}, {transform_indices = @transform_1, window_bounds = array<i64: 128, 128>}, {transform_indices = @transform_2, window_bounds = array<i64: 1, 128>}, {transform_indices = @transform_3, window_bounds = array<i64: 128, 128>}]} {
    %c0_i32 = arith.constant 0 : i32
    %0 = arith.cmpi eq, %arg2, %c0_i32 : i32
    %1 = arith.extui %0 : i1 to i32
    %c0_i32_0 = arith.constant 0 : i32
    %2 = arith.cmpi ne, %1, %c0_i32_0 : i32
    scf.if %2 {
      %cst_10 = arith.constant 0.000000e+00 : f32
      %12 = vector.broadcast %cst_10 : f32 to vector<128x128xf32>
      %c0_11 = arith.constant 0 : index
      %c0_12 = arith.constant 0 : index
      %13 = vector.load %arg7[%c0_11, %c0_12] : memref<128x128xf32, #tpu.memory_space<vmem>>, vector<128x128xf32>
      tpu.vector_store %arg7[%c0_11, %c0_12], %12 {strides = array<i32>} : memref<128x128xf32, #tpu.memory_space<vmem>>, vector<128x128xf32>,
    } else {
    }
    %c0 = arith.constant 0 : index
    %c0_1 = arith.constant 0 : index
    %3 = vector.load %arg7[%c0, %c0_1] : memref<128x128xf32, #tpu.memory_space<vmem>>, vector<128x128xf32>
    %c0_2 = arith.constant 0 : index
    %c0_3 = arith.constant 0 : index
    %4 = vector.load %arg3[%c0_2, %c0_3] : memref<128x128xbf16, #tpu.memory_space<vmem>>, vector<128x128xbf16>
    %c0_4 = arith.constant 0 : index
    %c0_5 = arith.constant 0 : index
    %5 = vector.load %arg4[%c0_4, %c0_5] : memref<128x128xbf16, #tpu.memory_space<vmem>>, vector<128x128xbf16>
    %cst = arith.constant dense<0.000000e+00> : vector<128x128xf32>
    %6 = tpu.matmul %4, %5, %cst {dimension_numbers = #tpu.dot_dimension_numbers<[1], [0], [0], [1], [0, 0, 1, 1], [], []>} : vector<128x128xbf16>, vector<128x128xbf16>, vector<128x128xf32> -> vector<128x128xf32>
    %7 = arith.addf %3, %6 : vector<128x128xf32>
    %c0_6 = arith.constant 0 : index
    %c0_7 = arith.constant 0 : index
    %8 = vector.load %arg7[%c0_6, %c0_7] : memref<128x128xf32, #tpu.memory_space<vmem>>, vector<128x128xf32>
    tpu.vector_store %arg7[%c0_6, %c0_7], %7 {strides = array<i32>} : memref<128x128xf32, #tpu.memory_space<vmem>>, vector<128x128xf32>,
    %c0_i32_8 = arith.constant 0 : i32
    %9 = arith.cmpi eq, %arg2, %c0_i32_8 : i32
    %10 = arith.extui %9 : i1 to i32
    %c0_i32_9 = arith.constant 0 : i32
    %11 = arith.cmpi ne, %10, %c0_i32_9 : i32
    scf.if %11 {
      %c0_10 = arith.constant 0 : index
      %c0_11 = arith.constant 0 : index
      %12 = vector.load %arg7[%c0_10, %c0_11] : memref<128x128xf32, #tpu.memory_space<vmem>>, vector<128x128xf32>
      %c0_12 = arith.constant 0 : index
      %c0_13 = arith.constant 0 : index
      %13 = vector.load %arg5[%c0_12, %c0_13] : memref<1x128xf32, #tpu.memory_space<vmem>>, vector<1x128xf32>
      %14 = vector.broadcast %13 : vector<1x128xf32> to vector<128x128xf32>
      %15 = arith.addf %12, %14 : vector<128x128xf32>
      %c0_14 = arith.constant 0 : index
      %c0_15 = arith.constant 0 : index
      %16 = vector.load %arg6[%c0_14, %c0_15] : memref<128x128xf32, #tpu.memory_space<vmem>>, vector<128x128xf32>
      tpu.vector_store %arg6[%c0_14, %c0_15], %15 {strides = array<i32>} : memref<128x128xf32, #tpu.memory_space<vmem>>, vector<128x128xf32>,
    } else {
    }
    return
  }
  func.func @transform_0(%arg0: i32, %arg1: i32, %arg2: i32) -> (i32, i32) {
    %c0_i32 = arith.constant 0 : i32
    return %arg0, %arg2 : i32, i32
  }
  func.func @transform_1(%arg0: i32, %arg1: i32, %arg2: i32) -> (i32, i32) {
    %c0_i32 = arith.constant 0 : i32
    return %arg2, %arg1 : i32, i32
  }
  func.func @transform_2(%arg0: i32, %arg1: i32, %arg2: i32) -> (i32, i32) {
    %c0_i32 = arith.constant 0 : i32
    %c0_i32_0 = arith.constant 0 : i32
    return %c0_i32, %arg1 : i32, i32
  }
  func.func @transform_3(%arg0: i32, %arg1: i32, %arg2: i32) -> (i32, i32) {
    %c0_i32 = arith.constant 0 : i32
    return %arg0, %arg1 : i32, i32
  }
}

</mosaic_0001>

<bundles_post_ra>
// kernel: tpu_custom_call.1
= control target key start
LH: loop header
LB: loop body
LE: loop exit
PB: predicated region body
PF: predicated region fallthrough
CT: control target
= control target key end

     0   :  { %8 = vsyncpa [#allocation4], 0  ;;  %s655_s0 = inlined_call_operand.hbm [shape: bf16[128,128], index: 0, kind: input, shape index: {}]   ;;  %s656_s1 = inlined_call_operand.hbm [shape: bf16[128,128], index: 1, kind: input, shape index: {}]   ;;  %s657_s2 = inlined_call_operand.vmem [shape: f32[1,128], index: 2, kind: input, shape index: {}]   ;;  %s658_s3 = inlined_call_operand.hbm [shape: f32[128,128], index: 3, kind: output, shape index: {}]  }
   0x1   :  { %9 = vsyncpa [#allocation7], 0 }
   0x2   :  { %10 = vsyncpa [#allocation5], 0  ;;  %s589_s12 = smov [#allocation3]   ;;  %s517_s16 = scalar_lea.hbm %s655_s0, 1024 }
   0x3   :  { %s16_s13 = sshll.u32 %s589_s12, 4  ;;  %p518_p0 = scmp.ne.s32.totalorder %s655_s0, %s517_s16  ;;  %s17_s13 = int_to_ptr.vmem [resolvable:$true] %s16_s13 }
   0x4   :  { %p521_p1 = scmp.lt.u32.totalorder %s517_s16, %s655_s0 }
   0x6   :  { %p523_p2 = pnand %p521_p1, %p518_p0 }
   0x8   :  { %526 = shalt.err (!%p523_p2)
}
   0x9   :  { %s527_s21 = scalar_lea.vmem %s17_s13, 1024  ;;  %p532_p4 = scmp.lt.s32.totalorder %s17_s13, %s17_s13 }
   0xa   :  { %p528_p3 = scmp.ne.s32.totalorder %s17_s13, %s527_s21  ;;  %p533_p5 = scmp.lt.s32.totalorder %s527_s21, %s527_s21 }
   0xc   :  { %p534_p6 = por %p533_p5, %p532_p4 }
   0xe   :  { %p535_p7 = pnand %p534_p6, %p528_p3 }
  0x10   :  { %538 = shalt.err (!%p535_p7)
}
  0x11   :  { %s590_s22 = smov 64   ;;  %s591_s23 = smov 4  }
  0x12   :  { %22 = dma.hbm_to_vmem [thread:$0]  %s655_s0, 1024, %s17_s13, [#allocation4], %s590_s22, %s590_s22, %s591_s23  }
  0x13   :  { %s592_s26 = smov [#allocation6]   ;;  %s539_s30 = scalar_lea.hbm %s656_s1, 1024 }
  0x14   :  { %s28_s27 = sshll.u32 %s592_s26, 4  ;;  %p540_p8 = scmp.ne.s32.totalorder %s656_s1, %s539_s30  ;;  %s29_s27 = int_to_ptr.vmem [resolvable:$true] %s28_s27 }
  0x15   :  { %p543_p9 = scmp.lt.u32.totalorder %s539_s30, %s656_s1 }
  0x17   :  { %p545_p10 = pnand %p543_p9, %p540_p8 }
  0x19   :  { %548 = shalt.err (!%p545_p10)
}
  0x1a   :  { %s549_s8 = scalar_lea.vmem %s29_s27, 1024  ;;  %p554_p12 = scmp.lt.s32.totalorder %s29_s27, %s29_s27 }
  0x1b   :  { %p550_p11 = scmp.ne.s32.totalorder %s29_s27, %s549_s8  ;;  %p555_p13 = scmp.lt.s32.totalorder %s549_s8, %s549_s8 }
  0x1d   :  { %p556_p0 = por %p555_p13, %p554_p12 }
  0x1f   :  { %p557_p1 = pnand %p556_p0, %p550_p11 }
  0x21   :  { %560 = shalt.err (!%p557_p1)
}
  0x22   :  { %34 = dma.hbm_to_vmem [thread:$0]  %s656_s1, 1024, %s29_s27, [#allocation7], %s590_s22, %s590_s22, %s591_s23  }
  0x23   :  { %583 = dma.done.wait [#allocation4], 1024  }
  0x24   :  { %584 = vsyncadd [#allocation4], 4294966272 }
  0x25   :  { %585 = dma.done.wait [#allocation7], 1024  }
  0x26   :  { %586 = vsyncadd [#allocation7], 4294966272  ;;  %v501_v0 = vld [vmem:[#allocation6] sm:$0xff]   ;;  %v502_v1 = vld [vmem:[#allocation6 + $0x8] sm:$0xff]  }
  0x27   :  { %446 = vmatprep.subr.bf16.mxu0 %v501_v0  ;;  %478 = vmatprep.subr.bf16.mxu1 %v501_v0  ;;  %v503_v2 = vld [vmem:[#allocation6 + $0x10] sm:$0xff]   ;;  %v504_v3 = vld [vmem:[#allocation6 + $0x18] sm:$0xff]   ;;  %v509_v4 = vld [vmem:[#allocation3] sm:$0xff]  }
  0x28   :  { %447 = vmatpush3.bf16.msra.mxu0 %v501_v0  ;;  %486 = vmatpush3.bf16.msra.mxu1 %v501_v0  ;;  %v510_v5 = vld [vmem:[#allocation3 + $0x20] sm:$0xff]   ;;  %v506_v7 = vld [vmem:[#allocation6 + $0x28] sm:$0xff]   ;;  %v507_v8 = vld [vmem:[#allocation6 + $0x30] sm:$0xff]  }
  0x29   :  { %448 = vmatprep.subr.bf16.mxu0 %v502_v1  ;;  %479 = vmatprep.subr.bf16.mxu1 %v502_v1  ;;  %v505_v6 = vld [vmem:[#allocation6 + $0x20] sm:$0xff]   ;;  %v508_v9 = vld [vmem:[#allocation6 + $0x38] sm:$0xff]   ;;  %v511_v10 = vld [vmem:[#allocation3 + $0x8] sm:$0xff]  }
  0x2a   :  { %462 = vmatprep.mubr.bf16.mxu0 %v509_v4  ;;  %470 = vmatprep.mubr.bf16.mxu1 %v510_v5  ;;  %v512_v11 = vld [vmem:[#allocation3 + $0x28] sm:$0xff]   ;;  %v513_v12 = vld [vmem:[#allocation3 + $0x10] sm:$0xff]   ;;  %v515_v14 = vld [vmem:[#allocation3 + $0x18] sm:$0xff]  }
  0x2b   :  { %v514_v13 = vld [vmem:[#allocation3 + $0x30] sm:$0xff]   ;;  %v516_v15 = vld [vmem:[#allocation3 + $0x38] sm:$0xff]   ;;  %v429_v16 = vld [vmem:[%s657_s2] ss:$0 sm:$0xff]  ;;  %s593_s2 = smov [#allocation8]  }
  0x2c   :  { %449 = vmatpush3.bf16.msra.mxu0 %v502_v1  ;;  %487 = vmatpush3.bf16.msra.mxu1 %v502_v1  ;;  %s400_s11 = sshll.u32 %s593_s2, 4  ;;  %s401_s11 = int_to_ptr.vmem [resolvable:$true] %s400_s11 }
  0x2d   :  { %450 = vmatprep.subr.bf16.mxu0 %v503_v2  ;;  %480 = vmatprep.subr.bf16.mxu1 %v503_v2  ;;  %s561_s12 = scalar_lea.vmem %s401_s11, 2048  ;;  %p566_p3 = scmp.lt.s32.totalorder %s401_s11, %s401_s11 }
  0x2e   :  { %p562_p2 = scmp.ne.s32.totalorder %s401_s11, %s561_s12  ;;  %p567_p4 = scmp.lt.s32.totalorder %s561_s12, %s561_s12 }
  0x30   :  { %451 = vmatpush3.bf16.msra.mxu0 %v503_v2  ;;  %488 = vmatpush3.bf16.msra.mxu1 %v503_v2  ;;  %p568_p5 = por %p567_p4, %p566_p3 }
  0x31   :  { %452 = vmatprep.subr.bf16.mxu0 %v504_v3  ;;  %481 = vmatprep.subr.bf16.mxu1 %v504_v3 }
  0x32   :  { %p569_p6 = pnand %p568_p5, %p562_p2 }
  0x34   :  { %453 = vmatpush3.bf16.msra.mxu0 %v504_v3  ;;  %489 = vmatpush3.bf16.msra.mxu1 %v504_v3 }
  0x35   :  { %454 = vmatprep.subr.bf16.mxu0 %v505_v6  ;;  %482 = vmatprep.subr.bf16.mxu1 %v505_v6 }
  0x38   :  { %455 = vmatpush3.bf16.msra.mxu0 %v505_v6  ;;  %490 = vmatpush3.bf16.msra.mxu1 %v505_v6 }
  0x39   :  { %456 = vmatprep.subr.bf16.mxu0 %v506_v7  ;;  %483 = vmatprep.subr.bf16.mxu1 %v506_v7 }
  0x3c   :  { %457 = vmatpush3.bf16.msra.mxu0 %v506_v7  ;;  %491 = vmatpush3.bf16.msra.mxu1 %v506_v7 }
  0x3d   :  { %458 = vmatprep.subr.bf16.mxu0 %v507_v8  ;;  %484 = vmatprep.subr.bf16.mxu1 %v507_v8 }
  0x40   :  { %459 = vmatpush3.bf16.msra.mxu0 %v507_v8  ;;  %492 = vmatpush3.bf16.msra.mxu1 %v507_v8 }
  0x41   :  { %460 = vmatprep.subr.bf16.mxu0 %v508_v9  ;;  %485 = vmatprep.subr.bf16.mxu1 %v508_v9 }
  0x44   :  { %461 = vmatpush3.bf16.msra.mxu0 %v508_v9  ;;  %493 = vmatpush3.bf16.msra.mxu1 %v508_v9 }
  0x47   :  { %463 = vmatmul.mubr.bf16.vlgmr.msra.gmra.mrb[0].mxu0 %v511_v10  ;;  %471 = vmatmul.mubr.bf16.vlgmr.msra.gmra.mrb[0].mxu1 %v512_v11 }
  0x48   :  { %466 = vmatprep.mubr.bf16.mxu0 %v513_v12  ;;  %474 = vmatprep.mubr.bf16.mxu1 %v514_v13 }
  0x4f   :  { %467 = vmatmul.mubr.bf16.gmra.mrb[4].mxu0 %v515_v14  ;;  %475 = vmatmul.mubr.bf16.gmra.mrb[4].mxu1 %v516_v15 }
 0x11a   :  { %v464_v17 = vpop.f32.mrb[0].mxu0  ;;  %v472_v18 = vpop.f32.mrb[0].mxu1 }
 0x11b   :  { %v365_v19 = vadd.f32 %v464_v17, %v429_v16  ;;  %v373_v20 = vadd.f32 %v472_v18, %v429_v16  ;;  %v242_v21 = vpop.f32.mrb[1].mxu0  ;;  %v274_v22 = vpop.f32.mrb[1].mxu1 }
 0x11c   :  { %v363_v23 = vadd.f32 %v429_v16, %v242_v21  ;;  %v371_v24 = vadd.f32 %v429_v16, %v274_v22  ;;  %v465_v25 = vpop.f32.mrb[2].mxu0  ;;  %v473_v26 = vpop.f32.mrb[2].mxu1 }
 0x11d   :  { %381 = vst [vmem:[#allocation8 + $0x10] sm:$0xff] %v365_v19  ;;  %389 = vst [vmem:[#allocation8 + $0x50] sm:$0xff] %v373_v20  ;;  %v366_v27 = vadd.f32 %v465_v25, %v429_v16  ;;  %v374_v28 = vadd.f32 %v473_v26, %v429_v16  ;;  %v245_v29 = vpop.f32.mrb[3].mxu0  ;;  %v277_v30 = vpop.f32.mrb[3].mxu1 }
 0x11e   :  { %379 = vst [vmem:[#allocation8] sm:$0xff] %v363_v23  ;;  %387 = vst [vmem:[#allocation8 + $0x40] sm:$0xff] %v371_v24  ;;  %v364_v31 = vadd.f32 %v429_v16, %v245_v29  ;;  %v372_v32 = vadd.f32 %v429_v16, %v277_v30 }
 0x11f   :  { %382 = vst [vmem:[#allocation8 + $0x18] sm:$0xff] %v366_v27  ;;  %390 = vst [vmem:[#allocation8 + $0x58] sm:$0xff] %v374_v28 }
 0x120   :  { %380 = vst [vmem:[#allocation8 + $0x8] sm:$0xff] %v364_v31  ;;  %388 = vst [vmem:[#allocation8 + $0x48] sm:$0xff] %v372_v32 }
 0x122   :  { %v468_v33 = vpop.f32.mrb[4].mxu0  ;;  %v476_v34 = vpop.f32.mrb[4].mxu1 }
 0x123   :  { %v369_v35 = vadd.f32 %v468_v33, %v429_v16  ;;  %v377_v36 = vadd.f32 %v476_v34, %v429_v16  ;;  %v258_v37 = vpop.f32.mrb[5].mxu0  ;;  %v290_v38 = vpop.f32.mrb[5].mxu1 }
 0x124   :  { %v367_v39 = vadd.f32 %v429_v16, %v258_v37  ;;  %v375_v40 = vadd.f32 %v429_v16, %v290_v38  ;;  %v469_v41 = vpop.f32.mrb[6].mxu0  ;;  %v477_v42 = vpop.f32.mrb[6].mxu1 }
 0x125   :  { %385 = vst [vmem:[#allocation8 + $0x30] sm:$0xff] %v369_v35  ;;  %393 = vst [vmem:[#allocation8 + $0x70] sm:$0xff] %v377_v36  ;;  %v370_v43 = vadd.f32 %v469_v41, %v429_v16  ;;  %v378_v44 = vadd.f32 %v477_v42, %v429_v16  ;;  %v261_v45 = vpop.f32.mrb[7].mxu0  ;;  %v293_v46 = vpop.f32.mrb[7].mxu1 }
 0x126   :  { %383 = vst [vmem:[#allocation8 + $0x20] sm:$0xff] %v367_v39  ;;  %391 = vst [vmem:[#allocation8 + $0x60] sm:$0xff] %v375_v40  ;;  %v368_v47 = vadd.f32 %v429_v16, %v261_v45  ;;  %v376_v48 = vadd.f32 %v429_v16, %v293_v46 }
 0x127   :  { %386 = vst [vmem:[#allocation8 + $0x38] sm:$0xff] %v370_v43  ;;  %394 = vst [vmem:[#allocation8 + $0x78] sm:$0xff] %v378_v44 }
 0x128   :  { %384 = vst [vmem:[#allocation8 + $0x28] sm:$0xff] %v368_v47  ;;  %392 = vst [vmem:[#allocation8 + $0x68] sm:$0xff] %v376_v48 }
 0x129   :  { %572 = shalt.err (!%p569_p6)
}
 0x12a   :  { %s573_s15 = scalar_lea.hbm %s658_s3, 2048 }
 0x12b   :  { %p574_p7 = scmp.ne.s32.totalorder %s658_s3, %s573_s15  ;;  %p577_p8 = scmp.lt.u32.totalorder %s573_s15, %s658_s3 }
 0x12d   :  { %p579_p9 = pnand %p577_p8, %p574_p7 }
 0x12f   :  { %582 = shalt.err (!%p579_p9)
}
 0x130   :  { %s594_s20 = smov 128   ;;  %s595_s21 = smov 8  }
 0x131   :  { %406 = dma.vmem_to_hbm [thread:$0]  %s401_s11, 2048, %s658_s3, [#allocation5], %s594_s20, %s594_s20, %s595_s21  }
 0x132   :  { %587 = dma.done.wait [#allocation5], 2048  }
 0x133   :  { %588 = vsyncadd [#allocation5], 4294965248 }
 0x134   :  { %410 = vsyncpa [#allocation4], 1 }
 0x135   :  { %411 = vsyncpa [#allocation7], 1 }
 0x136   :  { %412 = vsyncpa [#allocation5], 1 }

</bundles_post_ra>
